<compile_context>
chip_gen: v7x
topology: tpu7x:2x2x1
jax: 0.10.0
libtpu: 0.0.40
codegen_flags: <defaults>
</compile_context>

<pallas_src>
import functools

import jax
import jax.numpy as jnp
from jax.experimental import pallas as pl
from jax.experimental.pallas import tpu as pltpu


# Batches at or below this size use a single ungridded call with whole-array
# blocks (~1 KiB of VMEM per row incl. output padding -> 4 MiB at 4096 rows,
# comfortably inside every generation's scoped-VMEM default).  Larger batches
# take the gridded, batch-tiled path.
_UNGRIDDED_MAX_BATCH = 4096
_BATCH_TILE = 4096  # rows per grid step in the large-batch path (~2 MiB/block)


def _baseline_kernel(d_in, x_ref, w_ref, b_ref, o_ref):
    # x_ref: [Bt, D_in] VMEM  (natural row-major layout, features on lanes)
    # w_ref: [D_in]     SMEM  (weight row as scalars)
    # b_ref: [1]        SMEM  (scalar bias)
    # o_ref: [Bt, 1]    VMEM
    #
    # logits[:, 0] = sum_j x[:, j] * w[j] + b   as an unrolled VPU MAC:
    # each term is a [Bt, 1] column slice scaled by an SMEM scalar.
    acc = x_ref[:, 0:1] * w_ref[0]
    for j in range(1, d_in):
        acc = acc + x_ref[:, j:j + 1] * w_ref[j]
    logits = acc + b_ref[0]
    o_ref[...] = jax.nn.sigmoid(logits)  # EUP exp + VPU for the rest


def baseline_forward(x, weight, bias):
    """Forward pass of Baseline (MCDO=False, BN=False).

    x:      [B, D_in] f32
    weight: [D_out, D_in] f32 (PyTorch nn.Linear layout), D_out must be 1
    bias:   [D_out] f32
    returns [B, D_out] f32 = sigmoid(x @ weight.T + bias)
    """
    B, d_in = x.shape
    d_out = weight.shape[0]
    assert d_out == 1, "Baseline(output_dim=1) kernel is specialized to one output unit"

    w_flat = weight.reshape(d_in)  # free reshape: [1, D_in] -> [D_in] (contiguous)
    kernel = functools.partial(_baseline_kernel, d_in)

    cost = pl.CostEstimate(
        flops=2 * B * d_in * d_out,
        transcendentals=B * d_out,
        bytes_accessed=4 * (B * d_in + d_in + d_out + B * d_out),
    )
    out_shape = jax.ShapeDtypeStruct((B, d_out), jnp.float32)

    if B <= _UNGRIDDED_MAX_BATCH:
        # Small / typical batches: one ungridded call, whole-array blocks,
        # no per-step pipeline overhead, no wrapper-side data movement.
        return pl.pallas_call(
            kernel,
            out_shape=out_shape,
            in_specs=[
                pl.BlockSpec(memory_space=pltpu.MemorySpace.VMEM),   # x [B, D_in]
                pl.BlockSpec(memory_space=pltpu.MemorySpace.SMEM),   # w [D_in]
                pl.BlockSpec(memory_space=pltpu.MemorySpace.SMEM),   # b [1]
            ],
            out_specs=pl.BlockSpec(memory_space=pltpu.MemorySpace.VMEM),
            cost_estimate=cost,
        )(x, w_flat, bias)

    # Large batches: tile the batch axis.  4096-row f32 blocks are ~2 MiB each
    # (lane dim padded to 128), so double-buffered in/out stays well under the
    # scoped-VMEM defaults on v5e/v6e/v7x; "parallel" lets v7x's two
    # TensorCores split the batch.  Ragged final blocks are handled by Pallas
    # (padded reads, clipped writeback) and rows are independent, so that's safe.
    tile_b = _BATCH_TILE
    grid = (pl.cdiv(B, tile_b),)
    return pl.pallas_call(
        kernel,
        out_shape=out_shape,
        grid=grid,
        in_specs=[
            pl.BlockSpec((tile_b, d_in), lambda i: (i, 0)),
            pl.BlockSpec((d_in,), lambda i: (0,), memory_space=pltpu.MemorySpace.SMEM),
            pl.BlockSpec((d_out,), lambda i: (0,), memory_space=pltpu.MemorySpace.SMEM),
        ],
        out_specs=pl.BlockSpec((tile_b, d_out), lambda i: (i, 0)),
        compiler_params=pltpu.CompilerParams(
            dimension_semantics=("parallel",),
            vmem_limit_bytes=32 << 20,
        ),
        cost_estimate=cost,
    )(x, w_flat, bias)


baseline_forward_jit = jax.jit(baseline_forward)

# TODO(synk): the BN=True / MCDO=True constructor branches (BatchNorm1d, Dropout,
# hidden layer) are not implemented; the default Baseline() disables both.


if __name__ == "__main__":
    key = jax.random.PRNGKey(0)
    kx, kw, kb = jax.random.split(key, 3)

    batch = 8
    input_dim = 13
    output_dim = 1

    # Deterministic synthetic inputs/parameters (shapes from nn.Linear(13, 1)).
    x = jax.random.normal(kx, (batch, input_dim), dtype=jnp.float32)
    weight = jax.random.normal(kw, (output_dim, input_dim), dtype=jnp.float32) * 0.1
    bias = jax.random.normal(kb, (output_dim,), dtype=jnp.float32) * 0.1

    # Small-batch (ungridded) path.
    out = jax.block_until_ready(baseline_forward_jit(x, weight, bias))
    ref = jax.nn.sigmoid(x @ weight.T + bias)
    assert out.shape == (batch, output_dim)
    assert jnp.allclose(out, ref, atol=1e-5, rtol=1e-5)

    # Large-batch (gridded, batch-tiled, parallel) path.
    big_batch = 8192
    xb = jax.random.normal(kx, (big_batch, input_dim), dtype=jnp.float32)
    outb = jax.block_until_ready(baseline_forward_jit(xb, weight, bias))
    refb = jax.nn.sigmoid(xb @ weight.T + bias)
    assert outb.shape == (big_batch, output_dim)
    assert jnp.allclose(outb, refb, atol=1e-5, rtol=1e-5)

    print("KERNEL_OK")
</pallas_src>

<mosaic_0001>
module attributes {stable_mosaic.version = 11 : i64} {
  func.func @_baseline_kernel(%arg0: memref<8x13xf32, #tpu.memory_space<vmem>>, %arg1: memref<13xf32, #tpu.memory_space<smem>>, %arg2: memref<1xf32, #tpu.memory_space<smem>>, %arg3: memref<8x1xf32, #tpu.memory_space<vmem>>) attributes {dimension_semantics = [], scalar_prefetch = 0 : i64, scratch_operands = 0 : i64, tpu.core_type = #tpu.core_type<tc>} {
    %c0 = arith.constant 0 : index
    %c0_0 = arith.constant 0 : index
    %0 = vector.load %arg0[%c0, %c0_0] : memref<8x13xf32, #tpu.memory_space<vmem>>, vector<8x1xf32>
    %c0_1 = arith.constant 0 : index
    %1 = memref.load %arg1[%c0_1] : memref<13xf32, #tpu.memory_space<smem>>
    %2 = vector.broadcast %1 : f32 to vector<8x1xf32>
    %3 = arith.mulf %0, %2 : vector<8x1xf32>
    %c0_2 = arith.constant 0 : index
    %c1 = arith.constant 1 : index
    %4 = vector.load %arg0[%c0_2, %c1] : memref<8x13xf32, #tpu.memory_space<vmem>>, vector<8x1xf32>
    %c1_3 = arith.constant 1 : index
    %5 = memref.load %arg1[%c1_3] : memref<13xf32, #tpu.memory_space<smem>>
    %6 = vector.broadcast %5 : f32 to vector<8x1xf32>
    %7 = arith.mulf %4, %6 : vector<8x1xf32>
    %8 = arith.addf %3, %7 : vector<8x1xf32>
    %c0_4 = arith.constant 0 : index
    %c2 = arith.constant 2 : index
    %9 = vector.load %arg0[%c0_4, %c2] : memref<8x13xf32, #tpu.memory_space<vmem>>, vector<8x1xf32>
    %c2_5 = arith.constant 2 : index
    %10 = memref.load %arg1[%c2_5] : memref<13xf32, #tpu.memory_space<smem>>
    %11 = vector.broadcast %10 : f32 to vector<8x1xf32>
    %12 = arith.mulf %9, %11 : vector<8x1xf32>
    %13 = arith.addf %8, %12 : vector<8x1xf32>
    %c0_6 = arith.constant 0 : index
    %c3 = arith.constant 3 : index
    %14 = vector.load %arg0[%c0_6, %c3] : memref<8x13xf32, #tpu.memory_space<vmem>>, vector<8x1xf32>
    %c3_7 = arith.constant 3 : index
    %15 = memref.load %arg1[%c3_7] : memref<13xf32, #tpu.memory_space<smem>>
    %16 = vector.broadcast %15 : f32 to vector<8x1xf32>
    %17 = arith.mulf %14, %16 : vector<8x1xf32>
    %18 = arith.addf %13, %17 : vector<8x1xf32>
    %c0_8 = arith.constant 0 : index
    %c4 = arith.constant 4 : index
    %19 = vector.load %arg0[%c0_8, %c4] : memref<8x13xf32, #tpu.memory_space<vmem>>, vector<8x1xf32>
    %c4_9 = arith.constant 4 : index
    %20 = memref.load %arg1[%c4_9] : memref<13xf32, #tpu.memory_space<smem>>
    %21 = vector.broadcast %20 : f32 to vector<8x1xf32>
    %22 = arith.mulf %19, %21 : vector<8x1xf32>
    %23 = arith.addf %18, %22 : vector<8x1xf32>
    %c0_10 = arith.constant 0 : index
    %c5 = arith.constant 5 : index
    %24 = vector.load %arg0[%c0_10, %c5] : memref<8x13xf32, #tpu.memory_space<vmem>>, vector<8x1xf32>
    %c5_11 = arith.constant 5 : index
    %25 = memref.load %arg1[%c5_11] : memref<13xf32, #tpu.memory_space<smem>>
    %26 = vector.broadcast %25 : f32 to vector<8x1xf32>
    %27 = arith.mulf %24, %26 : vector<8x1xf32>
    %28 = arith.addf %23, %27 : vector<8x1xf32>
    %c0_12 = arith.constant 0 : index
    %c6 = arith.constant 6 : index
    %29 = vector.load %arg0[%c0_12, %c6] : memref<8x13xf32, #tpu.memory_space<vmem>>, vector<8x1xf32>
    %c6_13 = arith.constant 6 : index
    %30 = memref.load %arg1[%c6_13] : memref<13xf32, #tpu.memory_space<smem>>
    %31 = vector.broadcast %30 : f32 to vector<8x1xf32>
    %32 = arith.mulf %29, %31 : vector<8x1xf32>
    %33 = arith.addf %28, %32 : vector<8x1xf32>
    %c0_14 = arith.constant 0 : index
    %c7 = arith.constant 7 : index
    %34 = vector.load %arg0[%c0_14, %c7] : memref<8x13xf32, #tpu.memory_space<vmem>>, vector<8x1xf32>
    %c7_15 = arith.constant 7 : index
    %35 = memref.load %arg1[%c7_15] : memref<13xf32, #tpu.memory_space<smem>>
    %36 = vector.broadcast %35 : f32 to vector<8x1xf32>
    %37 = arith.mulf %34, %36 : vector<8x1xf32>
    %38 = arith.addf %33, %37 : vector<8x1xf32>
    %c0_16 = arith.constant 0 : index
    %c8 = arith.constant 8 : index
    %39 = vector.load %arg0[%c0_16, %c8] : memref<8x13xf32, #tpu.memory_space<vmem>>, vector<8x1xf32>
    %c8_17 = arith.constant 8 : index
    %40 = memref.load %arg1[%c8_17] : memref<13xf32, #tpu.memory_space<smem>>
    %41 = vector.broadcast %40 : f32 to vector<8x1xf32>
    %42 = arith.mulf %39, %41 : vector<8x1xf32>
    %43 = arith.addf %38, %42 : vector<8x1xf32>
    %c0_18 = arith.constant 0 : index
    %c9 = arith.constant 9 : index
    %44 = vector.load %arg0[%c0_18, %c9] : memref<8x13xf32, #tpu.memory_space<vmem>>, vector<8x1xf32>
    %c9_19 = arith.constant 9 : index
    %45 = memref.load %arg1[%c9_19] : memref<13xf32, #tpu.memory_space<smem>>
    %46 = vector.broadcast %45 : f32 to vector<8x1xf32>
    %47 = arith.mulf %44, %46 : vector<8x1xf32>
    %48 = arith.addf %43, %47 : vector<8x1xf32>
    %c0_20 = arith.constant 0 : index
    %c10 = arith.constant 10 : index
    %49 = vector.load %arg0[%c0_20, %c10] : memref<8x13xf32, #tpu.memory_space<vmem>>, vector<8x1xf32>
    %c10_21 = arith.constant 10 : index
    %50 = memref.load %arg1[%c10_21] : memref<13xf32, #tpu.memory_space<smem>>
    %51 = vector.broadcast %50 : f32 to vector<8x1xf32>
    %52 = arith.mulf %49, %51 : vector<8x1xf32>
    %53 = arith.addf %48, %52 : vector<8x1xf32>
    %c0_22 = arith.constant 0 : index
    %c11 = arith.constant 11 : index
    %54 = vector.load %arg0[%c0_22, %c11] : memref<8x13xf32, #tpu.memory_space<vmem>>, vector<8x1xf32>
    %c11_23 = arith.constant 11 : index
    %55 = memref.load %arg1[%c11_23] : memref<13xf32, #tpu.memory_space<smem>>
    %56 = vector.broadcast %55 : f32 to vector<8x1xf32>
    %57 = arith.mulf %54, %56 : vector<8x1xf32>
    %58 = arith.addf %53, %57 : vector<8x1xf32>
    %c0_24 = arith.constant 0 : index
    %c12 = arith.constant 12 : index
    %59 = vector.load %arg0[%c0_24, %c12] : memref<8x13xf32, #tpu.memory_space<vmem>>, vector<8x1xf32>
    %c12_25 = arith.constant 12 : index
    %60 = memref.load %arg1[%c12_25] : memref<13xf32, #tpu.memory_space<smem>>
    %61 = vector.broadcast %60 : f32 to vector<8x1xf32>
    %62 = arith.mulf %59, %61 : vector<8x1xf32>
    %63 = arith.addf %58, %62 : vector<8x1xf32>
    %c0_26 = arith.constant 0 : index
    %64 = memref.load %arg2[%c0_26] : memref<1xf32, #tpu.memory_space<smem>>
    %65 = vector.broadcast %64 : f32 to vector<8x1xf32>
    %66 = arith.addf %63, %65 : vector<8x1xf32>
    %67 = arith.negf %66 : vector<8x1xf32>
    %68 = math.exp %67 : vector<8x1xf32>
    %cst = arith.constant 1.000000e+00 : f32
    %69 = vector.broadcast %cst : f32 to vector<8x1xf32>
    %70 = arith.addf %69, %68 : vector<8x1xf32>
    %71 = arith.divf %69, %70 : vector<8x1xf32>
    %c0_27 = arith.constant 0 : index
    %c0_28 = arith.constant 0 : index
    %72 = vector.load %arg3[%c0_27, %c0_28] : memref<8x1xf32, #tpu.memory_space<vmem>>, vector<8x1xf32>
    tpu.vector_store %arg3[%c0_27, %c0_28], %71 {strides = array<i32>} : memref<8x1xf32, #tpu.memory_space<vmem>>, vector<8x1xf32>,
    return
  }
}

</mosaic_0001>

<bundles_post_ra>
// kernel: baseline_forward.1
= control target key start
LH: loop header
LB: loop body
LE: loop exit
PB: predicated region body
PF: predicated region fallthrough
CT: control target
= control target key end

     0   :  { %9 = vsyncpa [#allocation4], 0  ;;  %s281_s0 = inlined_call_operand.hbm [shape: f32[8,13], index: 0, kind: input, shape index: {}]   ;;  %s282_s1 = inlined_call_operand.vmem [shape: f32[13], index: 1, kind: input, shape index: {}]   ;;  %s283_s2 = inlined_call_operand.<no memory space> [shape: f32[1], index: 2, kind: input, shape index: {}]   ;;  %s284_s3 = inlined_call_operand.vmem [shape: f32[8,1], index: 3, kind: output, shape index: {}]  }
   0x1   :  { %10 = vsyncpa [#allocation5], 0  ;;  %s27_s14 = sshll.u32 %s282_s1, 4  ;;  %s226_s15 = smov [#allocation3]   ;;  %s28_s14 = int_to_ptr.vmem [resolvable:$true] %s27_s14 }
   0x2   :  { %s17_s16 = sshll.u32 %s226_s15, 4  ;;  %s188_s19 = scalar_lea.hbm %s281_s0, 128  ;;  %s18_s16 = int_to_ptr.vmem [resolvable:$true] %s17_s16 }
   0x3   :  { %p189_p0 = scmp.ne.s32.totalorder %s281_s0, %s188_s19  ;;  %p192_p1 = scmp.lt.u32.totalorder %s188_s19, %s281_s0 }
   0x5   :  { %p194_p2 = pnand %p192_p1, %p189_p0 }
   0x7   :  { %197 = shalt.err (!%p194_p2)
}
   0x8   :  { %s198_s24 = scalar_lea.vmem %s18_s16, 128  ;;  %p203_p4 = scmp.lt.s32.totalorder %s18_s16, %s18_s16 }
   0x9   :  { %p199_p3 = scmp.ne.s32.totalorder %s18_s16, %s198_s24  ;;  %p204_p5 = scmp.lt.s32.totalorder %s198_s24, %s198_s24 }
   0xb   :  { %p205_p6 = por %p204_p5, %p203_p4 }
   0xd   :  { %p206_p7 = pnand %p205_p6, %p199_p3 }
   0xf   :  { %209 = shalt.err (!%p206_p7)
}
  0x10   :  { %20 = dma.hbm_to_vmem [thread:$0]  %s281_s0, 128, %s18_s16, [#allocation4]  }
  0x11   :  { %s210_s26 = scalar_lea.vmem %s28_s14, 16  ;;  %p215_p9 = scmp.lt.s32.totalorder %s28_s14, %s28_s14 }
  0x12   :  { %p211_p8 = scmp.ne.s32.totalorder %s28_s14, %s210_s26  ;;  %p216_p10 = scmp.lt.s32.totalorder %s210_s26, %s210_s26 }
  0x14   :  { %p217_p11 = por %p216_p10, %p215_p9 }
  0x16   :  { %p218_p12 = pnand %p217_p11, %p211_p8 }
  0x18   :  { %221 = shalt.err (!%p218_p12)
}
  0x19   :  { %s227_s27 = smov [#allocation6]  }
  0x1a   :  { %30 = dma.vmem_to_smem %s28_s14, 16, %s227_s27, [#allocation5]  }
  0x1b   :  { %222 = dma.done.wait [#allocation4], 128  }
  0x1c   :  { %223 = vsyncadd [#allocation4], 4294967168 }
  0x1d   :  { %224 = dma.done.wait [#allocation5], 16  }
  0x1e   :  { %225 = vsyncadd [#allocation5], 4294967280 }
  0x1f   :  { %39 = sfence }
  0x20   :  { %s157_s28 = sld [smem:[#allocation6 + $0x1]]  ;;  %s159_s29 = sld [smem:[#allocation6 + $0x3]]  ;;  %v40_v0 = vld [vmem:[#allocation3] sm:$0xff]  ;;  %v141_v50 = vstv %s283_s2  ;;  %vm149_vm0 = vcmask 7168  }
  0x21   :  { %s158_s30 = sld [smem:[#allocation6 + $0x2]]  ;;  %s160_s4 = sld [smem:[#allocation6 + $0x4]] }
  0x22   :  { %s161_s0 = sld [smem:[#allocation6 + $0x5]]  ;;  %s162_s5 = sld [smem:[#allocation6 + $0x6]] }
  0x23   :  { %s163_s6 = sld [smem:[#allocation6 + $0x7]]  ;;  %s164_s7 = sld [smem:[#allocation6 + $0x8]] }
  0x24   :  { %s228_s8 = smov 127   ;;  %s229_s9 = smov 125  }
  0x25   :  { %s165_s10 = sld [smem:[#allocation6 + $0x9]]  ;;  %s166_s11 = sld [smem:[#allocation6 + $0xa]] }
  0x26   :  { %v45_v1 = vstv %s157_s28  ;;  %v61_v3 = vstv %s159_s29  ;;  %s230_s12 = smov 126   ;;  %s231_s13 = smov 124  }
  0x27   :  { %v46_v2 = vmul.f32 %v45_v1, %v40_v0  ;;  %v62_v4 = vmul.f32 %v61_v3, %v40_v0  ;;  %v53_v5 = vstv %s158_s30  ;;  %v69_v7 = vstv %s160_s4  ;;  %s167_s14 = sld [smem:[#allocation6 + $0xb]]  ;;  %s168_s15 = sld [smem:[#allocation6 + $0xc]] }
  0x28   :  { %v54_v6 = vmul.f32 %v53_v5, %v40_v0  ;;  %v70_v8 = vmul.f32 %v69_v7, %v40_v0  ;;  %v77_v9 = vstv %s161_s0  ;;  %v85_v10 = vstv %s162_s5  ;;  %s232_s16 = smov 123   ;;  %s233_s17 = smov 122  }
  0x29   :  { %48 = vrot.lane.b32.xlu0 %v46_v2, %s228_s8  ;;  %64 = vrot.lane.b32.xlu1 %v62_v4, %s229_s9  ;;  %v78_v11 = vmul.f32 %v77_v9, %v40_v0  ;;  %v86_v12 = vmul.f32 %v85_v10, %v40_v0  ;;  %v93_v13 = vstv %s163_s6  ;;  %v101_v14 = vstv %s164_s7  ;;  %s234_s18 = smov 121   ;;  %s235_s19 = smov 120  }
  0x2a   :  { %v94_v15 = vmul.f32 %v93_v13, %v40_v0  ;;  %v102_v16 = vmul.f32 %v101_v14, %v40_v0  ;;  %s236_s20 = smov 119   ;;  %s237_s21 = smov 118  }
  0x2b   :  { %v109_v17 = vstv %s165_s10  ;;  %v117_v18 = vstv %s166_s11  ;;  %s238_s22 = smov 117   ;;  %s239_s23 = smov 116  }
  0x2c   :  { %v110_v19 = vmul.f32 %v109_v17, %v40_v0  ;;  %v118_v20 = vmul.f32 %v117_v18, %v40_v0  ;;  %s41_s24 = sld [smem:[#allocation6]] }
  0x2d   :  { %56 = vrot.lane.b32.xlu0 %v54_v6, %s230_s12  ;;  %72 = vrot.lane.b32.xlu1 %v70_v8, %s231_s13  ;;  %v125_v21 = vstv %s167_s14  ;;  %v133_v22 = vstv %s168_s15 }
  0x2e   :  { %v126_v23 = vmul.f32 %v125_v21, %v40_v0  ;;  %v134_v24 = vmul.f32 %v133_v22, %v40_v0 }
  0x31   :  { %80 = vrot.lane.b32.xlu0 %v78_v11, %s232_s16  ;;  %88 = vrot.lane.b32.xlu1 %v86_v12, %s233_s17 }
  0x32   :  { %v42_v25 = vstv %s41_s24 }
  0x33   :  { %v43_v26 = vmul.f32 %v42_v25, %v40_v0 }
  0x35   :  { %96 = vrot.lane.b32.xlu0 %v94_v15, %s234_s18  ;;  %104 = vrot.lane.b32.xlu1 %v102_v16, %s235_s19 }
  0x39   :  { %112 = vrot.lane.b32.xlu0 %v110_v19, %s236_s20  ;;  %120 = vrot.lane.b32.xlu1 %v118_v20, %s237_s21 }
  0x3d   :  { %128 = vrot.lane.b32.xlu0 %v126_v23, %s238_s22  ;;  %136 = vrot.lane.b32.xlu1 %v134_v24, %s239_s23 }
  0x9b   :  { %v49_v27 = vpop.permute.xlu0 %48  ;;  %v65_v28 = vpop.permute.xlu1 %64 }
  0x9c   :  { %v51_v29 = vadd.f32 %v49_v27, %v43_v26 }
  0x9f   :  { %v57_v30 = vpop.permute.xlu0 %56  ;;  %v73_v32 = vpop.permute.xlu1 %72 }
  0xa0   :  { %v59_v31 = vadd.f32 %v57_v30, %v51_v29 }
  0xa2   :  { %v67_v33 = vadd.f32 %v65_v28, %v59_v31 }
  0xa3   :  { %v81_v34 = vpop.permute.xlu0 %80  ;;  %v89_v36 = vpop.permute.xlu1 %88 }
  0xa4   :  { %v75_v35 = vadd.f32 %v73_v32, %v67_v33 }
  0xa6   :  { %v83_v37 = vadd.f32 %v81_v34, %v75_v35 }
  0xa7   :  { %v97_v38 = vpop.permute.xlu0 %96  ;;  %v105_v40 = vpop.permute.xlu1 %104 }
  0xa8   :  { %v91_v39 = vadd.f32 %v89_v36, %v83_v37 }
  0xaa   :  { %v99_v41 = vadd.f32 %v97_v38, %v91_v39 }
  0xab   :  { %v113_v42 = vpop.permute.xlu0 %112  ;;  %v121_v44 = vpop.permute.xlu1 %120 }
  0xac   :  { %v107_v43 = vadd.f32 %v105_v40, %v99_v41 }
  0xae   :  { %v115_v45 = vadd.f32 %v113_v42, %v107_v43 }
  0xaf   :  { %v129_v46 = vpop.permute.xlu0 %128  ;;  %v137_v48 = vpop.permute.xlu1 %136 }
  0xb0   :  { %v123_v47 = vadd.f32 %v121_v44, %v115_v45 }
  0xb2   :  { %v131_v49 = vadd.f32 %v129_v46, %v123_v47 }
  0xb4   :  { %v139_v51 = vadd.f32 %v137_v48, %v131_v49 }
  0xb6   :  { %v142_v52 = vadd.f32 %v141_v50, %v139_v51 }
  0xb8   :  { %v169_v53 = vmul.f32 -1.442695, %v142_v52 }
  0xba   :  { %184 = vpow2.f32 %v169_v53 }
  0xc4   :  { %v185_v54 = vpop.eup %184 }
  0xc5   :  { %v146_v55 = vadd.f32 1.0, %v185_v54 }
  0xc7   :  { %186 = vrcp.f32 %v146_v55 }
  0xd1   :  { %v187_v56 = vpop.eup %186 }
  0xd2   :  { %150 = vst.msk [vmem:[%s284_s3] sm:$0xff] %vm149_vm0, %v187_v56 }
  0xd3   :  { %155 = vsyncpa [#allocation4], 1 }
  0xd4   :  { %156 = vsyncpa [#allocation5], 1 }

</bundles_post_ra>
